<compile_context>
chip_gen: v6e
topology: v6e:2x2x1
jax: 0.10.0
libtpu: 0.0.40
codegen_flags: <defaults>
</compile_context>

<pallas_src>
import jax
import jax.numpy as jnp
import numpy as np
from jax.experimental import pallas as pl
from jax.experimental.pallas import tpu as pltpu
from jax.scipy.linalg import block_diag

EPS = 1e-5  # nn.GroupNorm default eps


def _decoder_kernel(x_ref, xt_ref, w1_ref, w2_ref, wo_ref, seg_ref, aff_ref,
                    bo_ref, o_ref):
    """All M heads fused along lanes, one row-tile of the batch per grid step.

    x_ref   : (tn, L)        input rows, matmul compute dtype (bf16/f32)
    xt_ref  : (tn, M*L)      input tiled M times along lanes, f32 (residual)
    w1_ref  : (L,  M*L)      concat_m W1_m^T
    w2_ref  : (M*L, M*L)     blockdiag_m W2_m^T
    wo_ref  : (M*L, M*P)     blockdiag_m Wout_m^T
    seg_ref : (M*L, M*L)     block-diagonal segment-mean matrix (1/L blocks), f32
    aff_ref : (8,  M*L)      rows: b1, g1, be1, b2, g2, be2, 0, 0 (f32)
    bo_ref  : (1,  M*P)      output_fc bias (f32)
    o_ref   : (tn, M*P)      lane-dense output slab
    """
    x_c = x_ref[...]
    xt = xt_ref[...]
    w1 = w1_ref[...]
    w2 = w2_ref[...]
    wo = wo_ref[...]
    seg = seg_ref[...]
    aff = aff_ref[...]
    b1, g1, be1 = aff[0:1], aff[1:2], aff[2:3]
    b2, g2, be2 = aff[3:4], aff[4:5], aff[5:6]
    bo = bo_ref[...]

    # ---- layer 1: Linear + GroupNorm(1, L) + ReLU, all heads along lanes ----
    h = jnp.dot(x_c, w1, preferred_element_type=jnp.float32) + b1
    mu = jnp.dot(h, seg, preferred_element_type=jnp.float32)        # per-head mean
    hc = h - mu
    var = jnp.dot(hc * hc, seg, preferred_element_type=jnp.float32)  # biased var
    h = hc * jax.lax.rsqrt(var + EPS) * g1 + be1
    h = jnp.maximum(h, 0.0)

    # ---- layer 2: block-diag Linear + GroupNorm + residual + ReLU ----
    h2 = jnp.dot(h.astype(w2.dtype), w2, preferred_element_type=jnp.float32) + b2
    mu2 = jnp.dot(h2, seg, preferred_element_type=jnp.float32)
    hc2 = h2 - mu2
    var2 = jnp.dot(hc2 * hc2, seg, preferred_element_type=jnp.float32)
    h2 = hc2 * jax.lax.rsqrt(var2 + EPS) * g2 + be2
    h2 = jnp.maximum(h2 + xt, 0.0)

    # ---- output projection: block-diag -> lane-dense (tn, M*P) slab ----
    out = jnp.dot(h2.astype(wo.dtype), wo, preferred_element_type=jnp.float32) + bo
    o_ref[...] = out.astype(o_ref.dtype)


def _choose_row_block(n):
    """Whole-batch block for small N; multiple-of-8 row tiles for large N."""
    if n <= 512:
        return n
    for tb in (512, 256, 128, 64, 32, 16, 8):
        if n % tb == 0:
            return tb
    return n


def decoder_residual_pallas(x_c, x_tiled, w1t, w2bd, wobd, seg, aff, bo):
    """Run all fused heads; returns (N, M*P) float32 (lane-dense slab)."""
    N, L = x_c.shape
    MP = wobd.shape[1]
    ML = wobd.shape[0]
    tn = _choose_row_block(N)
    grid = (N // tn,)
    return pl.pallas_call(
        _decoder_kernel,
        out_shape=jax.ShapeDtypeStruct((N, MP), jnp.float32),
        grid_spec=pltpu.PrefetchScalarGridSpec(
            num_scalar_prefetch=0,
            grid=grid,
            in_specs=[
                pl.BlockSpec((tn, L), lambda i: (i, 0)),    # x (compute dtype)
                pl.BlockSpec((tn, ML), lambda i: (i, 0)),   # x tiled (f32, residual)
                pl.BlockSpec((L, ML), lambda i: (0, 0)),    # W1_all^T
                pl.BlockSpec((ML, ML), lambda i: (0, 0)),   # W2 block-diag^T
                pl.BlockSpec((ML, MP), lambda i: (0, 0)),   # Wout block-diag^T
                pl.BlockSpec((ML, ML), lambda i: (0, 0)),   # segment-mean matrix
                pl.BlockSpec((8, ML), lambda i: (0, 0)),    # packed bias/affine slab
                pl.BlockSpec((1, MP), lambda i: (0, 0)),    # output bias
            ],
            out_specs=pl.BlockSpec((tn, MP), lambda i: (i, 0)),
        ),
        compiler_params=pltpu.CompilerParams(
            dimension_semantics=("parallel",)),  # row tiles split across TCs on v7x
    )(x_c, x_tiled, w1t, w2bd, wobd, seg, aff, bo)


def _pack_params(params, idx, compute_dtype):
    """Fuse the selected heads' parameters along lanes (trace-time, free)."""
    L = params[idx[0]]["w1"].shape[0]
    M = len(idx)
    w1t = jnp.concatenate([params[i]["w1"].T for i in idx], axis=1)          # (L, M*L)
    w2bd = block_diag(*[params[i]["w2"].T for i in idx])                     # (M*L, M*L)
    wobd = block_diag(*[params[i]["wo"].T for i in idx])                     # (M*L, M*P)
    seg = block_diag(*([jnp.full((L, L), 1.0 / L, jnp.float32)] * M))        # (M*L, M*L)
    cat = lambda k: jnp.concatenate([params[i][k] for i in idx])
    zeros = jnp.zeros((M * L,), jnp.float32)
    aff = jnp.stack([cat("b1"), cat("g1"), cat("be1"),
                     cat("b2"), cat("g2"), cat("be2"), zeros, zeros])        # (8, M*L)
    bo = cat("bo")[None, :]                                                  # (1, M*P)
    return (w1t.astype(compute_dtype), w2bd.astype(compute_dtype),
            wobd.astype(compute_dtype), seg, aff.astype(jnp.float32), bo)


def decoder_residual_forward(decoder_in, params, mod_steps, *,
                             training=False, is_frozen=False,
                             compute_dtype=jnp.bfloat16,
                             xla_fallback_single_head=False):
    """Mirrors DecoderResidual.forward.

    decoder_in : (N, latent_size) float32
    params     : list of per-head parameter dicts (PyTorch Linear layouts)
    Returns (N, num_selected_heads, num_preds * 2) float32.
    """
    m_total = sum(mod_steps)
    if not training:                      # eval: run every head
        idx = list(range(m_total))
    elif is_frozen:                       # frozen: only the later heads
        idx = list(range(mod_steps[0], m_total))
    else:                                 # warm-up: only head 0
        idx = [0]

    # 1-head warm-up branch: pallas_call launch dominates ~130 KFLOP; let XLA fuse it.
    if xla_fallback_single_head and len(idx) == 1:
        return _prediction_net_ref(decoder_in, params[idx[0]])[:, None, :]

    M = len(idx)
    P = params[idx[0]]["wo"].shape[0]
    N = decoder_in.shape[0]
    w1t, w2bd, wobd, seg, aff, bo = _pack_params(params, idx, compute_dtype)
    x_c = decoder_in.astype(compute_dtype)          # matmul operand only
    x_tiled = jnp.tile(decoder_in, (1, M))          # f32 residual, per-head lanes
    out = decoder_residual_pallas(x_c, x_tiled, w1t, w2bd, wobd, seg, aff, bo)
    # (N, M*P) -> (N, M, P): row-major reshape == stack(heads).swapaxes(0,1), free.
    return out.reshape(N, M, P)


# ---------------------------- pure-JAX reference ----------------------------

def _prediction_net_ref(x, p):
    h = x @ p["w1"].T + p["b1"]
    mu = jnp.mean(h, -1, keepdims=True)
    var = jnp.mean((h - mu) ** 2, -1, keepdims=True)
    h = (h - mu) * jax.lax.rsqrt(var + EPS) * p["g1"] + p["be1"]
    h = jnp.maximum(h, 0.0)
    h2 = h @ p["w2"].T + p["b2"]
    mu2 = jnp.mean(h2, -1, keepdims=True)
    var2 = jnp.mean((h2 - mu2) ** 2, -1, keepdims=True)
    h2 = (h2 - mu2) * jax.lax.rsqrt(var2 + EPS) * p["g2"] + p["be2"]
    h2 = h2 + x
    h2 = jnp.maximum(h2, 0.0)
    return h2 @ p["wo"].T + p["bo"]


def _decoder_residual_ref(x, params, idx):
    return jnp.swapaxes(jnp.stack([_prediction_net_ref(x, params[i]) for i in idx]), 0, 1)


if __name__ == "__main__":
    key = jax.random.PRNGKey(0)
    latent_size = 32          # args.latent_size
    num_preds = 32            # args.num_preds -> P = 64 per head
    mod_steps = [1, 2]        # M = 3 prediction heads
    N = 16                    # rows (agents) in decoder_in
    P = num_preds * 2
    M = sum(mod_steps)

    keys = jax.random.split(key, 1 + 10 * M)
    decoder_in = jax.random.normal(keys[0], (N, latent_size), jnp.float32)

    params = []
    kiter = iter(keys[1:])
    scale = 1.0 / np.sqrt(latent_size)
    for _ in range(M):
        p = dict(
            w1=jax.random.normal(next(kiter), (latent_size, latent_size), jnp.float32) * scale,
            b1=jax.random.normal(next(kiter), (latent_size,), jnp.float32) * 0.02,
            g1=1.0 + 0.1 * jax.random.normal(next(kiter), (latent_size,), jnp.float32),
            be1=0.02 * jax.random.normal(next(kiter), (latent_size,), jnp.float32),
            w2=jax.random.normal(next(kiter), (latent_size, latent_size), jnp.float32) * scale,
            b2=jax.random.normal(next(kiter), (latent_size,), jnp.float32) * 0.02,
            g2=1.0 + 0.1 * jax.random.normal(next(kiter), (latent_size,), jnp.float32),
            be2=0.02 * jax.random.normal(next(kiter), (latent_size,), jnp.float32),
            wo=jax.random.normal(next(kiter), (P, latent_size), jnp.float32) * scale,
            bo=jax.random.normal(next(kiter), (P,), jnp.float32) * 0.02,
        )
        params.append(p)

    ref = _decoder_residual_ref(decoder_in, params, list(range(M)))

    # eval path (training=False): ALL heads, bf16 MXU operands (default)
    out = jax.block_until_ready(
        decoder_residual_forward(decoder_in, params, mod_steps,
                                 training=False, is_frozen=False))
    assert out.shape == (N, M, P)
    np.testing.assert_allclose(np.asarray(out), np.asarray(ref), rtol=2e-2, atol=2e-2)

    # same path with f32 matmul operands: tight numerical check
    out_f32 = jax.block_until_ready(
        decoder_residual_forward(decoder_in, params, mod_steps,
                                 training=False, is_frozen=False,
                                 compute_dtype=jnp.float32))
    np.testing.assert_allclose(np.asarray(out_f32), np.asarray(ref), rtol=2e-4, atol=2e-4)

    # training branches (head selection resolved host-side, like torch self.training)
    out_frozen = jax.block_until_ready(
        decoder_residual_forward(decoder_in, params, mod_steps,
                                 training=True, is_frozen=True,
                                 compute_dtype=jnp.float32))
    assert out_frozen.shape == (N, M - mod_steps[0], P)
    np.testing.assert_allclose(
        np.asarray(out_frozen),
        np.asarray(_decoder_residual_ref(decoder_in, params, list(range(mod_steps[0], M)))),
        rtol=2e-4, atol=2e-4)

    out_single = jax.block_until_ready(
        decoder_residual_forward(decoder_in, params, mod_steps,
                                 training=True, is_frozen=False,
                                 compute_dtype=jnp.float32))
    assert out_single.shape == (N, 1, P)
    np.testing.assert_allclose(
        np.asarray(out_single),
        np.asarray(_decoder_residual_ref(decoder_in, params, [0])),
        rtol=2e-4, atol=2e-4)

    print("KERNEL_OK")
</pallas_src>

<mosaic_0001>
module attributes {stable_mosaic.version = 11 : i64} {
  func.func @_decoder_kernel(%arg0: i32, %arg1: memref<16x32xbf16, #tpu.memory_space<vmem>>, %arg2: memref<16x96xf32, #tpu.memory_space<vmem>>, %arg3: memref<32x96xbf16, #tpu.memory_space<vmem>>, %arg4: memref<96x96xbf16, #tpu.memory_space<vmem>>, %arg5: memref<96x192xbf16, #tpu.memory_space<vmem>>, %arg6: memref<96x96xf32, #tpu.memory_space<vmem>>, %arg7: memref<8x96xf32, #tpu.memory_space<vmem>>, %arg8: memref<1x192xf32, #tpu.memory_space<vmem>>, %arg9: memref<16x192xf32, #tpu.memory_space<vmem>>) attributes {dimension_semantics = [#tpu.dimension_semantics<parallel>], iteration_bounds = array<i64: 1>, scalar_prefetch = 0 : i64, scratch_operands = 0 : i64, tpu.core_type = #tpu.core_type<tc>, window_params = [{transform_indices = @transform_0, window_bounds = array<i64: 16, 32>}, {transform_indices = @transform_1, window_bounds = array<i64: 16, 96>}, {pipeline_mode = #tpu.pipeline_mode<synchronous>, transform_indices = @transform_2, window_bounds = array<i64: 32, 96>}, {pipeline_mode = #tpu.pipeline_mode<synchronous>, transform_indices = @transform_3, window_bounds = array<i64: 96, 96>}, {pipeline_mode = #tpu.pipeline_mode<synchronous>, transform_indices = @transform_4, window_bounds = array<i64: 96, 192>}, {pipeline_mode = #tpu.pipeline_mode<synchronous>, transform_indices = @transform_5, window_bounds = array<i64: 96, 96>}, {pipeline_mode = #tpu.pipeline_mode<synchronous>, transform_indices = @transform_6, window_bounds = array<i64: 8, 96>}, {pipeline_mode = #tpu.pipeline_mode<synchronous>, transform_indices = @transform_7, window_bounds = array<i64: 1, 192>}, {transform_indices = @transform_8, window_bounds = array<i64: 16, 192>}]} {
    %c0 = arith.constant 0 : index
    %c0_0 = arith.constant 0 : index
    %0 = vector.load %arg1[%c0, %c0_0] : memref<16x32xbf16, #tpu.memory_space<vmem>>, vector<16x32xbf16>
    %c0_1 = arith.constant 0 : index
    %c0_2 = arith.constant 0 : index
    %1 = vector.load %arg2[%c0_1, %c0_2] : memref<16x96xf32, #tpu.memory_space<vmem>>, vector<16x96xf32>
    %c0_3 = arith.constant 0 : index
    %c0_4 = arith.constant 0 : index
    %2 = vector.load %arg3[%c0_3, %c0_4] : memref<32x96xbf16, #tpu.memory_space<vmem>>, vector<32x96xbf16>
    %c0_5 = arith.constant 0 : index
    %c0_6 = arith.constant 0 : index
    %3 = vector.load %arg4[%c0_5, %c0_6] : memref<96x96xbf16, #tpu.memory_space<vmem>>, vector<96x96xbf16>
    %c0_7 = arith.constant 0 : index
    %c0_8 = arith.constant 0 : index
    %4 = vector.load %arg5[%c0_7, %c0_8] : memref<96x192xbf16, #tpu.memory_space<vmem>>, vector<96x192xbf16>
    %c0_9 = arith.constant 0 : index
    %c0_10 = arith.constant 0 : index
    %5 = vector.load %arg6[%c0_9, %c0_10] : memref<96x96xf32, #tpu.memory_space<vmem>>, vector<96x96xf32>
    %c0_11 = arith.constant 0 : index
    %c0_12 = arith.constant 0 : index
    %6 = vector.load %arg7[%c0_11, %c0_12] : memref<8x96xf32, #tpu.memory_space<vmem>>, vector<8x96xf32>
    %7 = vector.extract_strided_slice %6 {offsets = [0, 0], sizes = [1, 96], strides = [1, 1]} : vector<8x96xf32> to vector<1x96xf32>
    %8 = vector.extract_strided_slice %6 {offsets = [1, 0], sizes = [1, 96], strides = [1, 1]} : vector<8x96xf32> to vector<1x96xf32>
    %9 = vector.extract_strided_slice %6 {offsets = [2, 0], sizes = [1, 96], strides = [1, 1]} : vector<8x96xf32> to vector<1x96xf32>
    %10 = vector.extract_strided_slice %6 {offsets = [3, 0], sizes = [1, 96], strides = [1, 1]} : vector<8x96xf32> to vector<1x96xf32>
    %11 = vector.extract_strided_slice %6 {offsets = [4, 0], sizes = [1, 96], strides = [1, 1]} : vector<8x96xf32> to vector<1x96xf32>
    %12 = vector.extract_strided_slice %6 {offsets = [5, 0], sizes = [1, 96], strides = [1, 1]} : vector<8x96xf32> to vector<1x96xf32>
    %c0_13 = arith.constant 0 : index
    %c0_14 = arith.constant 0 : index
    %13 = vector.load %arg8[%c0_13, %c0_14] : memref<1x192xf32, #tpu.memory_space<vmem>>, vector<1x192xf32>
    %cst = arith.constant dense<0.000000e+00> : vector<16x96xf32>
    %14 = tpu.matmul %0, %2, %cst {dimension_numbers = #tpu.dot_dimension_numbers<[1], [0], [0], [1], [0, 0, 1, 1], [], []>} : vector<16x32xbf16>, vector<32x96xbf16>, vector<16x96xf32> -> vector<16x96xf32>
    %15 = vector.broadcast %7 : vector<1x96xf32> to vector<16x96xf32>
    %16 = arith.addf %14, %15 : vector<16x96xf32>
    %cst_15 = arith.constant dense<0.000000e+00> : vector<16x96xf32>
    %17 = tpu.matmul %16, %5, %cst_15 {dimension_numbers = #tpu.dot_dimension_numbers<[1], [0], [0], [1], [0, 0, 1, 1], [], []>} : vector<16x96xf32>, vector<96x96xf32>, vector<16x96xf32> -> vector<16x96xf32>
    %18 = arith.subf %16, %17 : vector<16x96xf32>
    %19 = arith.mulf %18, %18 : vector<16x96xf32>
    %cst_16 = arith.constant dense<0.000000e+00> : vector<16x96xf32>
    %20 = tpu.matmul %19, %5, %cst_16 {dimension_numbers = #tpu.dot_dimension_numbers<[1], [0], [0], [1], [0, 0, 1, 1], [], []>} : vector<16x96xf32>, vector<96x96xf32>, vector<16x96xf32> -> vector<16x96xf32>
    %cst_17 = arith.constant 9.99999974E-6 : f32
    %21 = vector.broadcast %cst_17 : f32 to vector<16x96xf32>
    %22 = arith.addf %20, %21 : vector<16x96xf32>
    %23 = math.rsqrt %22 : vector<16x96xf32>
    %24 = arith.mulf %18, %23 : vector<16x96xf32>
    %25 = vector.broadcast %8 : vector<1x96xf32> to vector<16x96xf32>
    %26 = arith.mulf %24, %25 : vector<16x96xf32>
    %27 = vector.broadcast %9 : vector<1x96xf32> to vector<16x96xf32>
    %28 = arith.addf %26, %27 : vector<16x96xf32>
    %cst_18 = arith.constant 0.000000e+00 : f32
    %29 = vector.broadcast %cst_18 : f32 to vector<16x96xf32>
    %30 = arith.maximumf %28, %29 : vector<16x96xf32>
    %31 = arith.truncf %30 : vector<16x96xf32> to vector<16x96xbf16>
    %cst_19 = arith.constant dense<0.000000e+00> : vector<16x96xf32>
    %32 = tpu.matmul %31, %3, %cst_19 {dimension_numbers = #tpu.dot_dimension_numbers<[1], [0], [0], [1], [0, 0, 1, 1], [], []>} : vector<16x96xbf16>, vector<96x96xbf16>, vector<16x96xf32> -> vector<16x96xf32>
    %33 = vector.broadcast %10 : vector<1x96xf32> to vector<16x96xf32>
    %34 = arith.addf %32, %33 : vector<16x96xf32>
    %cst_20 = arith.constant dense<0.000000e+00> : vector<16x96xf32>
    %35 = tpu.matmul %34, %5, %cst_20 {dimension_numbers = #tpu.dot_dimension_numbers<[1], [0], [0], [1], [0, 0, 1, 1], [], []>} : vector<16x96xf32>, vector<96x96xf32>, vector<16x96xf32> -> vector<16x96xf32>
    %36 = arith.subf %34, %35 : vector<16x96xf32>
    %37 = arith.mulf %36, %36 : vector<16x96xf32>
    %cst_21 = arith.constant dense<0.000000e+00> : vector<16x96xf32>
    %38 = tpu.matmul %37, %5, %cst_21 {dimension_numbers = #tpu.dot_dimension_numbers<[1], [0], [0], [1], [0, 0, 1, 1], [], []>} : vector<16x96xf32>, vector<96x96xf32>, vector<16x96xf32> -> vector<16x96xf32>
    %cst_22 = arith.constant 9.99999974E-6 : f32
    %39 = vector.broadcast %cst_22 : f32 to vector<16x96xf32>
    %40 = arith.addf %38, %39 : vector<16x96xf32>
    %41 = math.rsqrt %40 : vector<16x96xf32>
    %42 = arith.mulf %36, %41 : vector<16x96xf32>
    %43 = vector.broadcast %11 : vector<1x96xf32> to vector<16x96xf32>
    %44 = arith.mulf %42, %43 : vector<16x96xf32>
    %45 = vector.broadcast %12 : vector<1x96xf32> to vector<16x96xf32>
    %46 = arith.addf %44, %45 : vector<16x96xf32>
    %47 = arith.addf %46, %1 : vector<16x96xf32>
    %cst_23 = arith.constant 0.000000e+00 : f32
    %48 = vector.broadcast %cst_23 : f32 to vector<16x96xf32>
    %49 = arith.maximumf %47, %48 : vector<16x96xf32>
    %50 = arith.truncf %49 : vector<16x96xf32> to vector<16x96xbf16>
    %cst_24 = arith.constant dense<0.000000e+00> : vector<16x192xf32>
    %51 = tpu.matmul %50, %4, %cst_24 {dimension_numbers = #tpu.dot_dimension_numbers<[1], [0], [0], [1], [0, 0, 1, 1], [], []>} : vector<16x96xbf16>, vector<96x192xbf16>, vector<16x192xf32> -> vector<16x192xf32>
    %52 = vector.broadcast %13 : vector<1x192xf32> to vector<16x192xf32>
    %53 = arith.addf %51, %52 : vector<16x192xf32>
    %c0_25 = arith.constant 0 : index
    %c0_26 = arith.constant 0 : index
    %54 = vector.load %arg9[%c0_25, %c0_26] : memref<16x192xf32, #tpu.memory_space<vmem>>, vector<16x192xf32>
    tpu.vector_store %arg9[%c0_25, %c0_26], %53 {strides = array<i32>} : memref<16x192xf32, #tpu.memory_space<vmem>>, vector<16x192xf32>,
    return
  }
  func.func @transform_0(%arg0: i32) -> (i32, i32) {
    %c0_i32 = arith.constant 0 : i32
    %c0_i32_0 = arith.constant 0 : i32
    return %arg0, %c0_i32 : i32, i32
  }
  func.func @transform_1(%arg0: i32) -> (i32, i32) {
    %c0_i32 = arith.constant 0 : i32
    %c0_i32_0 = arith.constant 0 : i32
    return %arg0, %c0_i32 : i32, i32
  }
  func.func @transform_2(%arg0: i32) -> (i32, i32) {
    %c0_i32 = arith.constant 0 : i32
    %c0_i32_0 = arith.constant 0 : i32
    %c0_i32_1 = arith.constant 0 : i32
    return %c0_i32, %c0_i32_0 : i32, i32
  }
  func.func @transform_3(%arg0: i32) -> (i32, i32) {
    %c0_i32 = arith.constant 0 : i32
    %c0_i32_0 = arith.constant 0 : i32
    %c0_i32_1 = arith.constant 0 : i32
    return %c0_i32, %c0_i32_0 : i32, i32
  }
  func.func @transform_4(%arg0: i32) -> (i32, i32) {
    %c0_i32 = arith.constant 0 : i32
    %c0_i32_0 = arith.constant 0 : i32
    %c0_i32_1 = arith.constant 0 : i32
    return %c0_i32, %c0_i32_0 : i32, i32
  }
  func.func @transform_5(%arg0: i32) -> (i32, i32) {
    %c0_i32 = arith.constant 0 : i32
    %c0_i32_0 = arith.constant 0 : i32
    %c0_i32_1 = arith.constant 0 : i32
    return %c0_i32, %c0_i32_0 : i32, i32
  }
  func.func @transform_6(%arg0: i32) -> (i32, i32) {
    %c0_i32 = arith.constant 0 : i32
    %c0_i32_0 = arith.constant 0 : i32
    %c0_i32_1 = arith.constant 0 : i32
    return %c0_i32, %c0_i32_0 : i32, i32
  }
  func.func @transform_7(%arg0: i32) -> (i32, i32) {
    %c0_i32 = arith.constant 0 : i32
    %c0_i32_0 = arith.constant 0 : i32
    %c0_i32_1 = arith.constant 0 : i32
    return %c0_i32, %c0_i32_0 : i32, i32
  }
  func.func @transform_8(%arg0: i32) -> (i32, i32) {
    %c0_i32 = arith.constant 0 : i32
    %c0_i32_0 = arith.constant 0 : i32
    return %arg0, %c0_i32 : i32, i32
  }
}

</mosaic_0001>

<bundles_post_ra>
// kernel: tpu_custom_call.1
= control target key start
LH: loop header
LB: loop body
LE: loop exit
PB: predicated region body
PF: predicated region fallthrough
CT: control target
= control target key end

     0   :  { %13 = vsyncpa [#allocation3], 0  ;;  %s1518_s0 = inlined_call_operand.hbm [shape: bf16[16,32], index: 0, kind: input, shape index: {}]   ;;  %s1519_s1 = inlined_call_operand.hbm [shape: f32[16,96], index: 1, kind: input, shape index: {}]   ;;  %s1520_s2 = inlined_call_operand.hbm [shape: bf16[32,96], index: 2, kind: input, shape index: {}]   ;;  %s1521_s3 = inlined_call_operand.hbm [shape: bf16[96,96], index: 3, kind: input, shape index: {}]   ;;  %s1522_s4 = inlined_call_operand.hbm [shape: bf16[96,192], index: 4, kind: input, shape index: {}]   ;;  %s1523_s5 = inlined_call_operand.hbm [shape: f32[96,96], index: 5, kind: input, shape index: {}]   ;;  %s1524_s6 = inlined_call_operand.vmem [shape: f32[8,96], index: 6, kind: input, shape index: {}]   ;;  %s1525_s7 = inlined_call_operand.vmem [shape: f32[1,192], index: 7, kind: input, shape index: {}]   ;;  %s1526_s8 = inlined_call_operand.hbm [shape: f32[16,192], index: 8, kind: output, shape index: {}]  }
   0x1   :  { %14 = vsyncpa [#allocation6], 0 }
   0x2   :  { %15 = vsyncpa [#allocation9], 0 }
   0x3   :  { %16 = vsyncpa [#allocation12], 0 }
   0x4   :  { %17 = vsyncpa [#allocation4], 0  ;;  %s1255_s27 = smov [#allocation5]  }
   0x5   :  { %s35_s28 = sshll.u32 %s1255_s27, 4  ;;  %s36_s28 = int_to_ptr.vmem [resolvable:$true] %s35_s28 }
   0x6   :  { %s1113_s29 = scalar_lea.vmem %s36_s28, 256  ;;  %p1118_p1 = scmp.lt.s32.totalorder %s36_s28, %s36_s28 }
   0x7   :  { %p1114_p0 = scmp.ne.s32.totalorder %s36_s28, %s1113_s29  ;;  %p1119_p2 = scmp.lt.s32.totalorder %s1113_s29, %s1113_s29 }
   0x9   :  { %p1120_p3 = por %p1119_p2, %p1118_p1 }
   0xb   :  { %p1121_p4 = pnand %p1120_p3, %p1114_p0 }
   0xd   :  { %1124 = shalt.err (!%p1121_p4)
}
   0xe   :  { %s1256_s30 = smov 128   ;;  %s1257_s9 = smov 8  }
   0xf   :  { %41 = dma.hbm_to_vmem [thread:$0]  %s1519_s1, 256, %s36_s28, [#allocation6], %s1256_s30, %s1256_s30, %s1257_s9  }
  0x10   :  { %s1258_s12 = smov [#allocation8]   ;;  %s1259_s14 = smov [#allocation2]  }
  0x11   :  { %s59_s13 = sshll.u32 %s1258_s12, 4  ;;  %s23_s15 = sshll.u32 %s1259_s14, 4  ;;  %s60_s13 = int_to_ptr.vmem [resolvable:$true] %s59_s13  ;;  %s24_s15 = int_to_ptr.vmem [resolvable:$true] %s23_s15 }
  0x12   :  { %s1133_s16 = scalar_lea.vmem %s60_s13, 768  ;;  %p1138_p6 = scmp.lt.s32.totalorder %s60_s13, %s60_s13 }
  0x13   :  { %p1134_p5 = scmp.ne.s32.totalorder %s60_s13, %s1133_s16  ;;  %p1139_p7 = scmp.lt.s32.totalorder %s1133_s16, %s1133_s16 }
  0x15   :  { %p1140_p8 = por %p1139_p7, %p1138_p6 }
  0x17   :  { %p1141_p9 = pnand %p1140_p8, %p1134_p5 }
  0x19   :  { %1144 = shalt.err (!%p1141_p9)
}
  0x1a   :  { %s1260_s17 = smov 64   ;;  %s1261_s18 = smov 4  }
  0x1b   :  { %65 = dma.hbm_to_vmem [thread:$0]  %s1521_s3, 768, %s60_s13, [#allocation9], %s1260_s17, %s1260_s17, %s1261_s18  }
  0x1c   :  { %s1153_s1 = scalar_lea.vmem %s24_s15, 128  ;;  %p1158_p11 = scmp.lt.s32.totalorder %s24_s15, %s24_s15 }
  0x1d   :  { %p1154_p10 = scmp.ne.s32.totalorder %s24_s15, %s1153_s1  ;;  %p1159_p12 = scmp.lt.s32.totalorder %s1153_s1, %s1153_s1 }
  0x1f   :  { %p1160_p13 = por %p1159_p12, %p1158_p11 }
  0x21   :  { %p1161_p0 = pnand %p1160_p13, %p1154_p10 }
  0x23   :  { %1164 = shalt.err (!%p1161_p0)
}
  0x24   :  { %29 = dma.hbm_to_vmem [thread:$0]  %s1518_s0, 128, %s24_s15, [#allocation3], %s1260_s17, %s1260_s17, %s1261_s18  }
  0x25   :  { %s1262_s23 = smov [#allocation7]   ;;  %s1263_s25 = smov [#allocation10]  }
  0x26   :  { %s47_s24 = sshll.u32 %s1262_s23, 4  ;;  %s71_s26 = sshll.u32 %s1263_s25, 4  ;;  %s48_s24 = int_to_ptr.vmem [resolvable:$true] %s47_s24  ;;  %s72_s26 = int_to_ptr.vmem [resolvable:$true] %s71_s26 }
  0x27   :  { %s1173_s27 = scalar_lea.vmem %s48_s24, 256  ;;  %p1178_p2 = scmp.lt.s32.totalorder %s48_s24, %s48_s24 }
  0x28   :  { %p1174_p1 = scmp.ne.s32.totalorder %s48_s24, %s1173_s27  ;;  %p1179_p3 = scmp.lt.s32.totalorder %s1173_s27, %s1173_s27 }
  0x2a   :  { %p1180_p4 = por %p1179_p3, %p1178_p2 }
  0x2c   :  { %p1181_p5 = pnand %p1180_p4, %p1174_p1 }
  0x2e   :  { %1184 = shalt.err (!%p1181_p5)
}
  0x2f   :  { %53 = dma.hbm_to_vmem [thread:$0]  %s1520_s2, 256, %s48_s24, [#allocation6], %s1260_s17, %s1260_s17, %s1261_s18  }
  0x30   :  { %s1193_s29 = scalar_lea.vmem %s72_s26, 1536  ;;  %p1198_p7 = scmp.lt.s32.totalorder %s72_s26, %s72_s26 }
  0x31   :  { %p1194_p6 = scmp.ne.s32.totalorder %s72_s26, %s1193_s29  ;;  %p1199_p8 = scmp.lt.s32.totalorder %s1193_s29, %s1193_s29 }
  0x33   :  { %p1200_p9 = por %p1199_p8, %p1198_p7 }
  0x35   :  { %p1201_p10 = pnand %p1200_p9, %p1194_p6 }
  0x37   :  { %1204 = shalt.err (!%p1201_p10)
}
  0x38   :  { %77 = dma.hbm_to_vmem [thread:$0]  %s1522_s4, 1536, %s72_s26, [#allocation9], %s1256_s30, %s1256_s30, %s1257_s9  }
  0x39   :  { %s1264_s11 = smov [#allocation11]  }
  0x3a   :  { %s83_s12 = sshll.u32 %s1264_s11, 4  ;;  %s84_s12 = int_to_ptr.vmem [resolvable:$true] %s83_s12 }
  0x3b   :  { %s1213_s13 = scalar_lea.vmem %s84_s12, 1536  ;;  %p1218_p12 = scmp.lt.s32.totalorder %s84_s12, %s84_s12 }
  0x3c   :  { %p1214_p11 = scmp.ne.s32.totalorder %s84_s12, %s1213_s13  ;;  %p1219_p13 = scmp.lt.s32.totalorder %s1213_s13, %s1213_s13 }
  0x3e   :  { %p1220_p0 = por %p1219_p13, %p1218_p12 }
  0x40   :  { %p1221_p1 = pnand %p1220_p0, %p1214_p11 }
  0x42   :  { %1224 = shalt.err (!%p1221_p1)
}
  0x43   :  { %89 = dma.hbm_to_vmem [thread:$0]  %s1523_s5, 1536, %s84_s12, [#allocation12], %s1256_s30, %s1256_s30, %s1257_s9  }
  0x44   :  { %1245 = dma.done.wait [#allocation3], 128  }
  0x45   :  { %1246 = vsyncadd [#allocation3], 4294967168 }
  0x46   :  { %1247 = dma.done.wait [#allocation6], 512  }
  0x47   :  { %1248 = vsyncadd [#allocation6], 4294966784 }
  0x48   :  { %1249 = dma.done.wait [#allocation9], 2304  }
  0x49   :  { %1250 = vsyncadd [#allocation9], 4294964992 }
  0x4a   :  { %1251 = dma.done.wait [#allocation12], 1536  }
  0x4b   :  { %1252 = vsyncadd [#allocation12], 4294965760  ;;  %v1265_v0 = vmov 0.0   ;;  %vm1266_vm0 = vmmov 0   ;;  %v1070_v1 = vld [vmem:[#allocation7 + $0x8] sm:$0xff]   ;;  %v1071_v2 = vld [vmem:[#allocation7] sm:$0xff]   ;;  %v159_v16 = vlaneseq }
  0x4c   :  { %922 = vmatprep.subr.bf16.mxu1 %v1265_v0  ;;  %926 = vmatprep.mubr.msk.bf16.mxu1 %vm1266_vm0, %v1265_v0  ;;  %v1347_v3 = vld [vmem:[#allocation11 + $0x58] sm:$0xff]  ;;  %v1072_v4 = vld [vmem:[#allocation2] sm:$0xff]   ;;  %v1350_v5 = vld [vmem:[#allocation11 + $0x50] sm:$0xff]  ;;  %vm180_vm1 = vcmask 261120   ;;  %vm225_vm2 = vcmask 785408   ;;  %vm800_vm3 = vcmask 523264  }
  0x4d   :  { %923 = vmatpush3.bf16.msra.mxu1 %v1070_v1  ;;  %957 = vmatprep.subr.mxu0 %v1347_v3  ;;  %v1353_v6 = vld [vmem:[#allocation11 + $0x48] sm:$0xff]  ;;  %v1357_v7 = vld [vmem:[#allocation11 + $0x40] sm:$0xff]  ;;  %v1361_v8 = vld [vmem:[#allocation11 + $0x38] sm:$0xff]  ;;  %v1421_v17 = vshrl.u32 %v159_v16, 7  ;;  %s1268_s9 = smov [#allocation13]  }
  0x4e   :  { %924 = vmatprep.subr.bf16.mxu1 %v1265_v0  ;;  %958 = vmatpush3.msra.mxu0 %v1347_v3  ;;  %v1367_v9 = vld [vmem:[#allocation11 + $0x30] sm:$0xff]  ;;  %v1377_v10 = vld [vmem:[#allocation11 + $0x28] sm:$0xff]  ;;  %v1383_v11 = vld [vmem:[#allocation11 + $0x20] sm:$0xff]  ;;  %s809_s15 = sshll.u32 %s1268_s9, 4  ;;  %s810_s15 = int_to_ptr.vmem [resolvable:$true] %s809_s15 }
  0x4f   :  { %959 = vmatprep.subr.mxu0 %v1350_v5  ;;  %v1389_v12 = vld [vmem:[#allocation11 + $0x18] sm:$0xff]  ;;  %v1401_v13 = vld [vmem:[#allocation11 + $0x10] sm:$0xff]  ;;  %v1406_v14 = vld [vmem:[#allocation11 + $0x8] sm:$0xff]  ;;  %v161_v18 = vsub.s32 0, %v1421_v17  ;;  %v398_v43 = vsub.s32 1, %v1421_v17  ;;  %v404_v44 = vsub.s32 2, %v1421_v17  ;;  %p1230_p3 = scmp.lt.s32.totalorder %s810_s15, %s810_s15 }
  0x50   :  { %960 = vmatpush3.msra.mxu0 %v1350_v5  ;;  %v1412_v15 = vld [vmem:[#allocation11] sm:$0xff]  ;;  %v1427_v19 = vld [vmem:[%s1524_s6] sm:$0xff]  ;;  %v1073_v33 = vld [vmem:[#allocation8 + $0x28] sm:$0xff]   ;;  %v413_v58 = vsub.s32 3, %v1421_v17 }
  0x51   :  { %925 = vmatpush3.bf16.msra.mxu1 %v1071_v2  ;;  %961 = vmatprep.subr.mxu0 %v1353_v6  ;;  %v162_v20 = vrot.slane %v1427_v19, %v161_v18  ;;  %v1074_v34 = vld [vmem:[#allocation8 + $0x20] sm:$0xff]   ;;  %v1075_v35 = vld [vmem:[#allocation8 + $0x18] sm:$0xff]   ;;  %v1076_v36 = vld [vmem:[#allocation8 + $0x10] sm:$0xff]   ;;  %v399_v45 = vrot.slane %v1427_v19, %v398_v43  ;;  %v405_v48 = vrot.slane %v1427_v19, %v404_v44 }
  0x52   :  { %930 = vmatprep.subr.mxu1 %v1347_v3  ;;  %962 = vmatpush3.msra.mxu0 %v1353_v6  ;;  %v1077_v37 = vld [vmem:[#allocation8 + $0x8] sm:$0xff]   ;;  %v1078_v38 = vld [vmem:[#allocation8] sm:$0xff]   ;;  %v414_v59 = vrot.slane %v1427_v19, %v413_v58 }
  0x53   :  { %963 = vmatprep.subr.mxu0 %v1357_v7  ;;  %v1091_v16 = vld [vmem:[#allocation10 + $0x10] ss:$8 sps:$4 sm:$0xff]  }
  0x54   :  { %927 = vmatmul.mubr.msk.bf16.vlgmr.msra.gmra.mxu1 %vm180_vm1, %v1072_v4  ;;  %964 = vmatpush3.msra.mxu0 %v1357_v7 }
  0x55   :  { %931 = vmatpush3.msra.mxu1 %v1347_v3  ;;  %965 = vmatprep.subr.mxu0 %v1361_v8 }
  0x56   :  { %932 = vmatprep.subr.mxu1 %v1350_v5  ;;  %966 = vmatpush3.msra.mxu0 %v1361_v8 }
  0x57   :  { %933 = vmatpush3.msra.mxu1 %v1350_v5  ;;  %967 = vmatprep.subr.mxu0 %v1367_v9 }
  0x58   :  { %934 = vmatprep.subr.mxu1 %v1353_v6  ;;  %968 = vmatpush3.msra.mxu0 %v1367_v9 }
  0x59   :  { %935 = vmatpush3.msra.mxu1 %v1353_v6  ;;  %969 = vmatprep.subr.mxu0 %v1377_v10 }
  0x5a   :  { %936 = vmatprep.subr.mxu1 %v1357_v7  ;;  %970 = vmatpush3.msra.mxu0 %v1377_v10 }
  0x5b   :  { %937 = vmatpush3.msra.mxu1 %v1357_v7  ;;  %971 = vmatprep.subr.mxu0 %v1383_v11 }
  0x5c   :  { %938 = vmatprep.subr.mxu1 %v1361_v8  ;;  %972 = vmatpush3.msra.mxu0 %v1383_v11 }
  0x5d   :  { %939 = vmatpush3.msra.mxu1 %v1361_v8  ;;  %973 = vmatprep.subr.mxu0 %v1389_v12 }
  0x5e   :  { %940 = vmatprep.subr.mxu1 %v1367_v9  ;;  %974 = vmatpush3.msra.mxu0 %v1389_v12 }
  0x5f   :  { %941 = vmatpush3.msra.mxu1 %v1367_v9  ;;  %975 = vmatprep.subr.mxu0 %v1401_v13 }
  0x60   :  { %942 = vmatprep.subr.mxu1 %v1377_v10  ;;  %976 = vmatpush3.msra.mxu0 %v1401_v13 }
  0x61   :  { %943 = vmatpush3.msra.mxu1 %v1377_v10  ;;  %977 = vmatprep.subr.mxu0 %v1406_v14 }
  0x62   :  { %944 = vmatprep.subr.mxu1 %v1383_v11  ;;  %978 = vmatpush3.msra.mxu0 %v1406_v14 }
  0x63   :  { %945 = vmatpush3.msra.mxu1 %v1383_v11  ;;  %979 = vmatprep.subr.mxu0 %v1412_v15 }
  0x64   :  { %946 = vmatprep.subr.mxu1 %v1389_v12  ;;  %980 = vmatpush3.msra.mxu0 %v1412_v15 }
  0x65   :  { %947 = vmatpush3.msra.mxu1 %v1389_v12  ;;  %1000 = vmatprep.subr.mxu0 %v1347_v3 }
  0x66   :  { %948 = vmatprep.subr.mxu1 %v1401_v13 }
  0x67   :  { %949 = vmatpush3.msra.mxu1 %v1401_v13 }
  0x68   :  { %950 = vmatprep.subr.mxu1 %v1406_v14 }
  0x69   :  { %951 = vmatpush3.msra.mxu1 %v1406_v14 }
  0x6a   :  { %952 = vmatprep.subr.mxu1 %v1412_v15 }
  0x6b   :  { %953 = vmatpush3.msra.mxu1 %v1412_v15 }
  0x6c   :  { %984 = vmatprep.subr.bf16.mxu1 %v1265_v0 }
 0x114   :  { %v218_v21 = vpop.f32.mrf.mxu1 }
 0x115   :  { %v219_v22 = vadd.f32 %v218_v21, %v162_v20  ;;  %v1096_v21 = vld [vmem:[#allocation10 + $0x4] ss:$8 sps:$4 sm:$0xff]  }
 0x116   :  { %v928_v23 = vpop.f32.mrf.mxu1 }
 0x117   :  { %954 = vmatprep.mubr.msk.f32.mxu1 %vm225_vm2, %v219_v22  ;;  %v1094_v23 = vld [vmem:[#allocation10] ss:$8 sps:$4 sm:$0xff]  }
 0x118   :  { %v221_v24 = vpop.f32.mrf.mxu1 }
 0x119   :  { %v222_v25 = vadd.f32 %v221_v24, %v162_v20  ;;  %v1093_v20 = vld [vmem:[#allocation10 + $0x14] ss:$8 sps:$4 sm:$0xff]  }
 0x11a   :  { %v929_v26 = vpop.f32.mrf.mxu1 }
 0x11b   :  { %955 = vmatmul.mubr.msk.f32.vlgmr.msra.gmra.mxu1 %vm225_vm2, %v222_v25 }
 0x11c   :  { %996 = vmatprep.mubr.msk.bf16.mxu1 %vm1266_vm0, %v1265_v0  ;;  %985 = vmatpush3.bf16.msra.mxu1 %v1073_v33 }
 0x11d   :  { %986 = vmatprep.subr.bf16.mxu1 %v1265_v0 }
 0x120   :  { %987 = vmatpush3.bf16.msra.mxu1 %v1074_v34 }
 0x121   :  { %988 = vmatprep.subr.bf16.mxu1 %v1265_v0 }
 0x124   :  { %989 = vmatpush3.bf16.msra.mxu1 %v1075_v35 }
 0x125   :  { %990 = vmatprep.subr.bf16.mxu1 %v1265_v0 }
 0x128   :  { %991 = vmatpush3.bf16.msra.mxu1 %v1076_v36 }
 0x129   :  { %992 = vmatprep.subr.bf16.mxu1 %v1265_v0 }
 0x12c   :  { %993 = vmatpush3.bf16.msra.mxu1 %v1077_v37  ;;  %v116_v37 = vld [vmem:[#allocation5 + $0x8] sm:$0xff] }
 0x12d   :  { %994 = vmatprep.subr.bf16.mxu1 %v1265_v0 }
 0x130   :  { %995 = vmatpush3.bf16.msra.mxu1 %v1078_v38 }
 0x131   :  { %1027 = vmatprep.subr.mxu1 %v1347_v3 }
 0x1db   :  { %v956_v27 = vpop.f32.mrf.mxu1 }
 0x1dc   :  { %v308_v28 = vsub.f32 %v222_v25, %v956_v27 }
 0x1dd   :  { %v298_v29 = vpop.f32.mrf.mxu1 }
 0x1de   :  { %v307_v30 = vsub.f32 %v219_v22, %v298_v29  ;;  %v310_v32 = vmul.f32 %v308_v28, %v308_v28  ;;  %v1267_v22 = vmov 0   ;;  %v673_v29 = vsub.s32 5, %v1421_v17 }
 0x1e0   :  { %v309_v31 = vmul.f32 %v307_v30, %v307_v30  ;;  %v674_v33 = vrot.slane %v1427_v19, %v673_v29 }
 0x1e2   :  { %981 = vmatprep.mubr.msk.f32.mxu0 %vm225_vm2, %v309_v31 }
 0x1e3   :  { %982 = vmatmul.mubr.msk.f32.vlgmr.msra.gmra.mxu0 %vm225_vm2, %v310_v32 }
 0x1e4   :  { %1001 = vmatpush3.msra.mxu0 %v1347_v3 }
 0x1e5   :  { %1002 = vmatprep.subr.mxu0 %v1350_v5 }
 0x1e6   :  { %1003 = vmatpush3.msra.mxu0 %v1350_v5 }
 0x1e7   :  { %1004 = vmatprep.subr.mxu0 %v1353_v6 }
 0x1e8   :  { %1005 = vmatpush3.msra.mxu0 %v1353_v6 }
 0x1e9   :  { %1006 = vmatprep.subr.mxu0 %v1357_v7 }
 0x1ea   :  { %1007 = vmatpush3.msra.mxu0 %v1357_v7 }
 0x1eb   :  { %1008 = vmatprep.subr.mxu0 %v1361_v8 }
 0x1ec   :  { %1009 = vmatpush3.msra.mxu0 %v1361_v8 }
 0x1ed   :  { %1010 = vmatprep.subr.mxu0 %v1367_v9 }
 0x1ee   :  { %1011 = vmatpush3.msra.mxu0 %v1367_v9 }
 0x1ef   :  { %1012 = vmatprep.subr.mxu0 %v1377_v10 }
 0x1f0   :  { %1013 = vmatpush3.msra.mxu0 %v1377_v10 }
 0x1f1   :  { %1014 = vmatprep.subr.mxu0 %v1383_v11 }
 0x1f2   :  { %1015 = vmatpush3.msra.mxu0 %v1383_v11 }
 0x1f3   :  { %1016 = vmatprep.subr.mxu0 %v1389_v12 }
 0x1f4   :  { %1017 = vmatpush3.msra.mxu0 %v1389_v12 }
 0x1f5   :  { %1018 = vmatprep.subr.mxu0 %v1401_v13 }
 0x1f6   :  { %1019 = vmatpush3.msra.mxu0 %v1401_v13 }
 0x1f7   :  { %1020 = vmatprep.subr.mxu0 %v1406_v14 }
 0x1f8   :  { %1021 = vmatpush3.msra.mxu0 %v1406_v14 }
 0x1f9   :  { %1022 = vmatprep.subr.mxu0 %v1412_v15 }
 0x1fa   :  { %1023 = vmatpush3.msra.mxu0 %v1412_v15 }
 0x2a3   :  { %v983_v39 = vpop.f32.mrf.mxu0 }
 0x2a4   :  { %v389_v40 = vadd.f32 1e-05, %v983_v39 }
 0x2a5   :  { %v383_v41 = vpop.f32.mrf.mxu0 }
 0x2a6   :  { %1097 = vrsqrt.f32 %v389_v40  ;;  %v384_v42 = vadd.f32 1e-05, %v383_v41  ;;  %v115_v40 = vld [vmem:[#allocation5] sm:$0xff] }
 0x2a8   :  { %1099 = vrsqrt.f32 %v384_v42 }
 0x2b3   :  { %v1098_v46 = vpop.eup %1097 }
 0x2b4   :  { %v395_v47 = vmul.f32 %v1098_v46, %v308_v28  ;;  %v667_v28 = vsub.s32 4, %v1421_v17 }
 0x2b5   :  { %v1100_v49 = vpop.eup %1099 }
 0x2b6   :  { %v394_v50 = vmul.f32 %v1100_v49, %v307_v30  ;;  %v401_v51 = vmul.f32 %v399_v45, %v395_v47  ;;  %v668_v30 = vrot.slane %v1427_v19, %v667_v28 }
 0x2b8   :  { %v400_v52 = vmul.f32 %v399_v45, %v394_v50  ;;  %v407_v53 = vadd.f32 %v405_v48, %v401_v51 }
 0x2ba   :  { %v406_v54 = vadd.f32 %v405_v48, %v400_v52  ;;  %v409_v56 = vmax.f32 %v407_v53, 0.0  ;;  %v158_v48 = vld [vmem:[%s1525_s7] sm:$0x3]  ;;  %s1225_s7 = scalar_lea.vmem %s810_s15, 512 }
 0x2bb   :  { %v686_v19 = vrot.slane %v158_v48, %v161_v18  ;;  %v690_v49 = vrot.slane %v158_v48, %v398_v43  ;;  %p1226_p2 = scmp.ne.s32.totalorder %s810_s15, %s1225_s7  ;;  %p1231_p4 = scmp.lt.s32.totalorder %s1225_s7, %s1225_s7 }
 0x2bc   :  { %v408_v55 = vmax.f32 %v406_v54, 0.0 }
 0x2bd   :  { %p1232_p5 = por %p1231_p4, %p1230_p3 }
 0x2be   :  { %v410_v57 = vpack.c.bf16 %v409_v56, %v408_v55 }
 0x2bf   :  { %p1233_p6 = pnand %p1232_p5, %p1226_p2 }
 0x2c0   :  { %997 = vmatmul.mubr.msk.bf16.vlgmr.msra.gmra.mxu1 %vm225_vm2, %v410_v57 }
 0x2c1   :  { %1028 = vmatpush3.msra.mxu1 %v1347_v3 }
 0x2c2   :  { %1029 = vmatprep.subr.mxu1 %v1350_v5 }
 0x2c3   :  { %1030 = vmatpush3.msra.mxu1 %v1350_v5 }
 0x2c4   :  { %1031 = vmatprep.subr.mxu1 %v1353_v6 }
 0x2c5   :  { %1032 = vmatpush3.msra.mxu1 %v1353_v6 }
 0x2c6   :  { %1033 = vmatprep.subr.mxu1 %v1357_v7 }
 0x2c7   :  { %1034 = vmatpush3.msra.mxu1 %v1357_v7 }
 0x2c8   :  { %1035 = vmatprep.subr.mxu1 %v1361_v8 }
 0x2c9   :  { %1036 = vmatpush3.msra.mxu1 %v1361_v8  ;;  %v1081_v8 = vld [vmem:[#allocation10 + $0x54] ss:$8 sps:$4 sm:$0xff]  }
 0x2ca   :  { %1037 = vmatprep.subr.mxu1 %v1367_v9  ;;  %760 = vmatprep.subr.bf16.mxu0 %v1081_v8 }
 0x2cb   :  { %1038 = vmatpush3.msra.mxu1 %v1367_v9  ;;  %v1079_v9 = vld [vmem:[#allocation10 + $0x50] ss:$8 sps:$4 sm:$0xff]  }
 0x2cc   :  { %1039 = vmatprep.subr.mxu1 %v1377_v10 }
 0x2cd   :  { %1040 = vmatpush3.msra.mxu1 %v1377_v10  ;;  %v1084_v10 = vld [vmem:[#allocation10 + $0x44] ss:$8 sps:$4 sm:$0xff]  }
 0x2ce   :  { %1041 = vmatprep.subr.mxu1 %v1383_v11 }
 0x2cf   :  { %1042 = vmatpush3.msra.mxu1 %v1383_v11  ;;  %v1082_v11 = vld [vmem:[#allocation10 + $0x40] ss:$8 sps:$4 sm:$0xff]  }
 0x2d0   :  { %1043 = vmatprep.subr.mxu1 %v1389_v12 }
 0x2d1   :  { %1044 = vmatpush3.msra.mxu1 %v1389_v12  ;;  %v1087_v12 = vld [vmem:[#allocation10 + $0x34] ss:$8 sps:$4 sm:$0xff]  }
 0x2d2   :  { %1045 = vmatprep.subr.mxu1 %v1401_v13 }
 0x2d3   :  { %1046 = vmatpush3.msra.mxu1 %v1401_v13  ;;  %v1085_v13 = vld [vmem:[#allocation10 + $0x30] ss:$8 sps:$4 sm:$0xff]  }
 0x2d4   :  { %1047 = vmatprep.subr.mxu1 %v1406_v14 }
 0x2d5   :  { %1048 = vmatpush3.msra.mxu1 %v1406_v14  ;;  %v1090_v14 = vld [vmem:[#allocation10 + $0x24] ss:$8 sps:$4 sm:$0xff]  }
 0x2d6   :  { %1049 = vmatprep.subr.mxu1 %v1412_v15 }
 0x2d7   :  { %1050 = vmatpush3.msra.mxu1 %v1412_v15  ;;  %v1088_v15 = vld [vmem:[#allocation10 + $0x20] ss:$8 sps:$4 sm:$0xff]  }
 0x380   :  { %v488_v60 = vpop.f32.mrf.mxu1 }
 0x381   :  { %v489_v61 = vadd.f32 %v488_v60, %v414_v59 }
 0x382   :  { %v998_v62 = vpop.f32.mrf.mxu1 }
 0x383   :  { %1024 = vmatprep.mubr.msk.f32.mxu0 %vm225_vm2, %v489_v61 }
 0x384   :  { %v491_v63 = vpop.f32.mrf.mxu1 }
 0x385   :  { %v492_v0 = vadd.f32 %v491_v63, %v414_v59 }
 0x386   :  { %v999_v1 = vpop.f32.mrf.mxu1 }
 0x387   :  { %1025 = vmatmul.mubr.msk.f32.vlgmr.msra.gmra.mxu0 %vm225_vm2, %v492_v0 }
 0x388   :  { %761 = vmatpush1.bf16.msra.mxu0 %v1079_v9  ;;  %788 = vmatprep.mubr.bf16.mxu0 %v1267_v22 }
 0x389   :  { %762 = vmatprep.subr.bf16.mxu0 %v1084_v10 }
 0x38c   :  { %763 = vmatpush1.bf16.msra.mxu0 %v1082_v11 }
 0x38d   :  { %764 = vmatprep.subr.bf16.mxu0 %v1087_v12 }
 0x390   :  { %765 = vmatpush1.bf16.msra.mxu0 %v1085_v13 }
 0x391   :  { %766 = vmatprep.subr.bf16.mxu0 %v1090_v14 }
 0x394   :  { %767 = vmatpush1.bf16.msra.mxu0 %v1088_v15 }
 0x395   :  { %768 = vmatprep.subr.bf16.mxu0 %v1093_v20 }
 0x398   :  { %769 = vmatpush1.bf16.msra.mxu0 %v1091_v16 }
 0x399   :  { %770 = vmatprep.subr.bf16.mxu0 %v1096_v21 }
 0x39c   :  { %771 = vmatpush1.bf16.msra.mxu0 %v1094_v23 }
 0x447   :  { %v1026_v2 = vpop.f32.mrf.mxu0 }
 0x448   :  { %v577_v3 = vsub.f32 %v492_v0, %v1026_v2 }
 0x449   :  { %v567_v4 = vpop.f32.mrf.mxu0 }
 0x44a   :  { %v576_v5 = vsub.f32 %v489_v61, %v567_v4  ;;  %v579_v7 = vmul.f32 %v577_v3, %v577_v3 }
 0x44c   :  { %v578_v6 = vmul.f32 %v576_v5, %v576_v5 }
 0x44e   :  { %1051 = vmatprep.mubr.msk.f32.mxu1 %vm225_vm2, %v578_v6 }
 0x44f   :  { %1052 = vmatmul.mubr.msk.f32.vlgmr.msra.gmra.mxu1 %vm225_vm2, %v579_v7 }
 0x50f   :  { %v1053_v24 = vpop.f32.mrf.mxu1 }
 0x510   :  { %v658_v25 = vadd.f32 1e-05, %v1053_v24 }
 0x511   :  { %v652_v26 = vpop.f32.mrf.mxu1 }
 0x512   :  { %1101 = vrsqrt.f32 %v658_v25  ;;  %v653_v27 = vadd.f32 1e-05, %v652_v26 }
 0x514   :  { %1103 = vrsqrt.f32 %v653_v27 }
 0x51f   :  { %v1102_v31 = vpop.eup %1101 }
 0x520   :  { %v664_v32 = vmul.f32 %v1102_v31, %v577_v3 }
 0x521   :  { %v1104_v34 = vpop.eup %1103 }
 0x522   :  { %v670_v35 = vmul.f32 %v668_v30, %v664_v32  ;;  %v663_v36 = vmul.f32 %v1104_v34, %v576_v5 }
 0x524   :  { %v669_v38 = vmul.f32 %v668_v30, %v663_v36  ;;  %v676_v39 = vadd.f32 %v674_v33, %v670_v35 }
 0x526   :  { %v675_v41 = vadd.f32 %v674_v33, %v669_v38  ;;  %v678_v42 = vadd.f32 %v676_v39, %v116_v37 }
 0x528   :  { %v677_v44 = vadd.f32 %v675_v41, %v115_v40  ;;  %v680_v46 = vmax.f32 %v678_v42, 0.0 }
 0x52a   :  { %v679_v45 = vmax.f32 %v677_v44, 0.0 }
 0x52c   :  { %v681_v47 = vpack.c.bf16 %v680_v46, %v679_v45 }
 0x52e   :  { %855 = vmatmul.mubr.msk.bf16.vlgmr.msra.gmra.mxu0 %vm225_vm2, %v681_v47 }
 0x5ee   :  { %v790_v50 = vpop.f32.mrf.mxu0 }
 0x5ef   :  { %v791_v51 = vadd.f32 %v790_v50, %v686_v19 }
 0x5f0   :  { %v792_v52 = vpop.f32.mrf.mxu0 }
 0x5f1   :  { %799 = vst [vmem:[#allocation13] sm:$0xff] %v791_v51  ;;  %v793_v53 = vadd.f32 %v792_v52, %v690_v49 }
 0x5f2   :  { %v794_v54 = vpop.f32.mrf.mxu0 }
 0x5f3   :  { %801 = vst.msk [vmem:[#allocation13 + $0x8] sm:$0xff] %vm800_vm3, %v793_v53  ;;  %v795_v55 = vadd.f32 %v794_v54, %v686_v19 }
 0x5f4   :  { %v796_v56 = vpop.f32.mrf.mxu0 }
 0x5f5   :  { %802 = vst [vmem:[#allocation13 + $0x10] sm:$0xff] %v795_v55  ;;  %v797_v57 = vadd.f32 %v796_v56, %v690_v49 }
 0x5f7   :  { %803 = vst.msk [vmem:[#allocation13 + $0x18] sm:$0xff] %vm800_vm3, %v797_v57 }
 0x5f8   :  { %1236 = shalt.err (!%p1233_p6)
}
 0x5f9   :  { %s1269_s16 = smov 256   ;;  %s1270_s17 = smov 16  }
 0x5fa   :  { %815 = dma.vmem_to_hbm [thread:$0]  %s810_s15, 512, %s1526_s8, [#allocation4], %s1269_s16, %s1269_s16, %s1270_s17  }
 0x5fb   :  { %1253 = dma.done.wait [#allocation4], 512  }
 0x5fc   :  { %1254 = vsyncadd [#allocation4], 4294966784 }
 0x5fd   :  { %819 = vsyncpa [#allocation3], 1 }
 0x5fe   :  { %820 = vsyncpa [#allocation6], 1 }
 0x5ff   :  { %821 = vsyncpa [#allocation9], 1 }
 0x600   :  { %822 = vsyncpa [#allocation12], 1 }
 0x601   :  { %823 = vsyncpa [#allocation4], 1 }

</bundles_post_ra>
